<compile_context>
chip_gen: v6e
topology: v6e:2x2x1
jax: 0.10.0
libtpu: 0.0.40
codegen_flags: <defaults>
</compile_context>

<pallas_src>
import math
import functools

import jax
import jax.numpy as jnp
from jax.experimental import pallas as pl
from jax.experimental.pallas import tpu as pltpu


def _pos_emb_kernel(x_ref, f_ref, o_ref, *, tile_b, half_dim, packed):
    """One grid step: rows [i*tile_b, (i+1)*tile_b) of the embedding.

    x_ref : (batch_padded, 1) f32 — resident timesteps (constant index_map)
    f_ref : (1, half_dim)     f32 — resident frequency table
    o_ref : (tile_b, 2, half_dim) if packed else (tile_b, 2*half_dim)
    """
    r0 = pl.multiple_of(pl.program_id(0) * tile_b, tile_b)
    x = x_ref[pl.ds(r0, tile_b), :]              # (tile_b, 1) f32
    arg = x * f_ref[...]                         # (tile_b, half_dim), f32 VPU
    s = jnp.sin(arg).astype(o_ref.dtype)         # EUP
    c = jnp.cos(arg).astype(o_ref.dtype)         # EUP
    if packed:
        o_ref[:, 0, :] = s                       # full-last-dim (lane-dense) stores
        o_ref[:, 1, :] = c
    else:
        o_ref[:, :half_dim] = s                  # half_dim % 128 == 0: already aligned
        o_ref[:, half_dim:] = c


def _round_up(a: int, b: int) -> int:
    return (a + b - 1) // b * b


def sinusoidal_pos_emb(
    x: jax.Array,
    dim: int,
    *,
    max_period: float = 10000.0,
    out_dtype=None,
    row_tile: int = 256,
) -> jax.Array:
    """JAX/Pallas equivalent of SinusoidalPosEmb.forward.

    x: 1-D array of timesteps, shape (batch,). Returns (batch, 2*(dim//2)).
    Note: for odd `dim` the output has dim-1 columns (matches the PyTorch module).
    """
    assert x.ndim == 1, "SinusoidalPosEmb expects a 1-D tensor of timesteps"
    half_dim = dim // 2
    assert half_dim >= 2, "dim must be >= 4 (PyTorch formula divides by half_dim - 1)"
    out_dim = 2 * half_dim
    batch = x.shape[0]

    if out_dtype is None:
        out_dtype = jnp.promote_types(x.dtype, jnp.float32)
    elem_bytes = jnp.dtype(out_dtype).itemsize

    # ---- row-tile selection: fixed cdiv tile, VMEM-bounded, >=2 grid steps ----
    batch8 = _round_up(batch, 8)
    tile_b = min(int(row_tile), batch8)
    # Keep one (double-buffered) output block comfortably under the 32 MiB
    # scoped default (v7x has only 64 MiB physical VMEM).
    vmem_budget = 8 * 1024 * 1024                              # per output buffer
    max_rows = max(8, (vmem_budget // max(1, out_dim * elem_bytes)) // 8 * 8)
    tile_b = min(tile_b, max_rows)
    # >=2 grid steps when the batch allows it (lets "parallel" use both v7x TCs).
    if batch8 >= 16:
        tile_b = min(tile_b, max(8, (batch8 // 2) // 8 * 8))
    tile_b = max(8, (tile_b // 8) * 8)

    batch_padded = _round_up(batch, tile_b)
    grid = (batch_padded // tile_b,)

    # ---- resident inputs ----
    x2d = x.astype(jnp.float32).reshape(batch, 1)
    if batch_padded != batch:
        x2d = jnp.pad(x2d, ((0, batch_padded - batch), (0, 0)))
    neg_log_scale = -(math.log(max_period) / (half_dim - 1))
    freqs = jnp.exp(
        jnp.arange(half_dim, dtype=jnp.float32) * neg_log_scale
    ).reshape(1, half_dim)

    packed = (half_dim % 128) != 0
    if packed:
        out_shape = jax.ShapeDtypeStruct((batch_padded, 2, half_dim), out_dtype)
        out_spec = pl.BlockSpec((tile_b, 2, half_dim), lambda i: (i, 0, 0))
    else:
        out_shape = jax.ShapeDtypeStruct((batch_padded, out_dim), out_dtype)
        out_spec = pl.BlockSpec((tile_b, out_dim), lambda i: (i, 0))

    kernel = functools.partial(
        _pos_emb_kernel, tile_b=tile_b, half_dim=half_dim, packed=packed
    )

    y = pl.pallas_call(
        kernel,
        out_shape=out_shape,
        grid=grid,
        in_specs=[
            pl.BlockSpec((batch_padded, 1), lambda i: (0, 0)),  # resident timesteps
            pl.BlockSpec((1, half_dim), lambda i: (0, 0)),      # resident freq table
        ],
        out_specs=out_spec,
        compiler_params=pltpu.CompilerParams(dimension_semantics=("parallel",)),
    )(x2d, freqs)

    if packed:
        y = y.reshape(batch_padded, out_dim)                    # free contiguous reshape
    return y[:batch]


if __name__ == "__main__":
    key = jax.random.PRNGKey(0)
    dim = 32
    batch = 8
    # Diffusion-style timesteps in [0, 1000).
    x = jax.random.uniform(key, (batch,), dtype=jnp.float32) * 1000.0

    y = sinusoidal_pos_emb(x, dim)
    y = jax.block_until_ready(y)

    # Pure-JAX reference (mirrors the PyTorch forward exactly).
    half_dim = dim // 2
    emb = math.log(10000.0) / (half_dim - 1)
    freqs = jnp.exp(jnp.arange(half_dim, dtype=jnp.float32) * -emb)
    arg = x[:, None] * freqs[None, :]
    ref = jnp.concatenate([jnp.sin(arg), jnp.cos(arg)], axis=-1)

    assert y.shape == (batch, dim), (y.shape, (batch, dim))
    assert y.dtype == ref.dtype, (y.dtype, ref.dtype)
    max_err = float(jnp.max(jnp.abs(y - ref)))
    assert max_err < 2e-3, f"mismatch vs reference, max abs err = {max_err}"

    print("KERNEL_OK")
</pallas_src>

<mosaic_0001>
module attributes {stable_mosaic.version = 11 : i64} {
  func.func @_pos_emb_kernel(%arg0: i32, %arg1: memref<8x1xf32, #tpu.memory_space<vmem>>, %arg2: memref<1x16xf32, #tpu.memory_space<vmem>>, %arg3: memref<8x2x16xf32, #tpu.memory_space<vmem>>) attributes {dimension_semantics = [#tpu.dimension_semantics<parallel>], iteration_bounds = array<i64: 1>, scalar_prefetch = 0 : i64, scratch_operands = 0 : i64, tpu.core_type = #tpu.core_type<tc>, window_params = [{pipeline_mode = #tpu.pipeline_mode<synchronous>, transform_indices = @transform_0, window_bounds = array<i64: 8, 1>}, {pipeline_mode = #tpu.pipeline_mode<synchronous>, transform_indices = @transform_1, window_bounds = array<i64: 1, 16>}, {transform_indices = @transform_2, window_bounds = array<i64: 8, 2, 16>}]} {
    %c8_i32 = arith.constant 8 : i32
    %0 = arith.muli %arg0, %c8_i32 : i32
    %1 = tpu.assume_multiple %0, 8 : i32
    %2 = arith.index_cast %1 : i32 to index
    %c0 = arith.constant 0 : index
    %3 = vector.load %arg1[%2, %c0] : memref<8x1xf32, #tpu.memory_space<vmem>>, vector<8x1xf32>
    %c0_0 = arith.constant 0 : index
    %c0_1 = arith.constant 0 : index
    %4 = vector.load %arg2[%c0_0, %c0_1] : memref<1x16xf32, #tpu.memory_space<vmem>>, vector<1x16xf32>
    %5 = vector.broadcast %3 : vector<8x1xf32> to vector<8x16xf32>
    %6 = vector.broadcast %4 : vector<1x16xf32> to vector<8x16xf32>
    %7 = arith.mulf %5, %6 : vector<8x16xf32>
    %8 = math.sin %7 : vector<8x16xf32>
    %9 = math.cos %7 : vector<8x16xf32>
    %c0_2 = arith.constant 0 : index
    %c0_3 = arith.constant 0 : index
    %c0_4 = arith.constant 0 : index
    %10 = vector.load %arg3[%c0_2, %c0_3, %c0_4] : memref<8x2x16xf32, #tpu.memory_space<vmem>>, vector<8x1x16xf32>
    %11 = vector.shape_cast %10 : vector<8x1x16xf32> to vector<8x16xf32>
    %12 = vector.shape_cast %8 : vector<8x16xf32> to vector<8x1x16xf32>
    tpu.vector_store %arg3[%c0_2, %c0_3, %c0_4], %12 {strides = array<i32>} : memref<8x2x16xf32, #tpu.memory_space<vmem>>, vector<8x1x16xf32>,
    %c0_5 = arith.constant 0 : index
    %c1 = arith.constant 1 : index
    %c0_6 = arith.constant 0 : index
    %13 = vector.load %arg3[%c0_5, %c1, %c0_6] : memref<8x2x16xf32, #tpu.memory_space<vmem>>, vector<8x1x16xf32>
    %14 = vector.shape_cast %13 : vector<8x1x16xf32> to vector<8x16xf32>
    %15 = vector.shape_cast %9 : vector<8x16xf32> to vector<8x1x16xf32>
    tpu.vector_store %arg3[%c0_5, %c1, %c0_6], %15 {strides = array<i32>} : memref<8x2x16xf32, #tpu.memory_space<vmem>>, vector<8x1x16xf32>,
    return
  }
  func.func @transform_0(%arg0: i32) -> (i32, i32) {
    %c0_i32 = arith.constant 0 : i32
    %c0_i32_0 = arith.constant 0 : i32
    %c0_i32_1 = arith.constant 0 : i32
    return %c0_i32, %c0_i32_0 : i32, i32
  }
  func.func @transform_1(%arg0: i32) -> (i32, i32) {
    %c0_i32 = arith.constant 0 : i32
    %c0_i32_0 = arith.constant 0 : i32
    %c0_i32_1 = arith.constant 0 : i32
    return %c0_i32, %c0_i32_0 : i32, i32
  }
  func.func @transform_2(%arg0: i32) -> (i32, i32, i32) {
    %c0_i32 = arith.constant 0 : i32
    %c0_i32_0 = arith.constant 0 : i32
    %c0_i32_1 = arith.constant 0 : i32
    return %arg0, %c0_i32, %c0_i32_0 : i32, i32, i32
  }
}

</mosaic_0001>

<bundles_post_ra>
// kernel: tpu_custom_call.1
= control target key start
LH: loop header
LB: loop body
LE: loop exit
PB: predicated region body
PF: predicated region fallthrough
CT: control target
= control target key end

     0   :  { %v435_v1 = vmov 0   ;;  %s507_s0 = inlined_call_operand.vmem [shape: f32[8,1], index: 0, kind: input, shape index: {}]   ;;  %s508_s1 = inlined_call_operand.vmem [shape: f32[1,16], index: 1, kind: input, shape index: {}]   ;;  %s509_s2 = inlined_call_operand.hbm [shape: f32[8,2,16], index: 2, kind: output, shape index: {}]  }
   0x1   :  { %v14_v0 = vld [vmem:[%s507_s0] sm:$0xff]  ;;  %408 = vset.pattern.permute.xlu0 %v435_v1 }
   0x2   :  { %18 = vperm.xlu0 %408, %v14_v0  }
   0x3   :  { %7 = vsyncpa [#allocation3], 0  ;;  %v384_v2 = vld [vmem:[%s508_s1] ss:$0 sm:$0xff]  ;;  %v436_v15 = vmov 683565275  }
   0x4   :  { %v437_v17 = vmov 2475754826   ;;  %v438_v20 = vmov 2131351028   ;;  %v439_v23 = vmov 2102212464  }
   0x5   :  { %v440_v26 = vmov 920167782   ;;  %v441_v29 = vmov 1326507024   ;;  %s443_s0 = smov [#allocation2]  }
   0x6   :  { %s373_s1 = sshll.u32 %s443_s0, 4  ;;  %s374_s1 = int_to_ptr.vmem [resolvable:$true] %s373_s1 }
   0x7   :  { %s413_s13 = scalar_lea.vmem %s374_s1, 256  ;;  %p418_p1 = scmp.lt.s32.totalorder %s374_s1, %s374_s1 }
   0x8   :  { %p414_p0 = scmp.ne.s32.totalorder %s374_s1, %s413_s13  ;;  %p419_p2 = scmp.lt.s32.totalorder %s413_s13, %s413_s13 }
   0xa   :  { %p420_p3 = por %p419_p2, %p418_p1 }
   0xc   :  { %p421_p4 = pnand %p420_p3, %p414_p0 }
  0x7d   :  { %v19_v3 = vpop.permute.xlu0 %18 }
  0x7e   :  { %v467_v4 = vmul.f32 %v384_v2, %v19_v3 }
  0x80   :  { %v31_v5 = vand.u32 2139095040, %v467_v4  ;;  %v28_v9 = vand.u32 2147483647, %v467_v4  ;;  %vm30_vm7 = vcmp.lt.s32.totalorder %v467_v4, 0  ;;  %vm120_vm15 = vweird.f32 %v467_v4 }
  0x82   :  { %v32_v6 = vshrl.u32 %v31_v5, 23  ;;  %v35_v12 = vand.u32 8388607, %v28_v9  ;;  %vm29_vm8 = vcmp.le.f32.partialorder %v28_v9, 0.7853982 }
  0x84   :  { %v385_v7 = vadd.s32 4294967169, %v32_v6  ;;  %v36_v31 = vor.u32 8388608, %v35_v12 }
  0x86   :  { %v38_v8 = vadd.s32 1, %v385_v7  ;;  %v76_v45 = vshll.u32 %v36_v31, 8 }
  0x88   :  { %vm39_vm0 = vcmp.gt.s32.totalorder %v38_v8, 0 }
  0x89   :  { %v40_v10 = vsel %vm39_vm0, %v38_v8, 0  ;;  %vm293_vm0 = vcmask 122880  }
  0x8a   :  { %v42_v11 = vand.u32 31, %v40_v10  ;;  %v41_v14 = vshrl.u32 %v40_v10, 5 }
  0x8c   :  { %v43_v13 = vsub.s32 32, %v42_v11  ;;  %v45_v16 = vshll.u32 %v436_v15, %v42_v11  ;;  %v48_v18 = vshll.u32 %v437_v17, %v42_v11  ;;  %v51_v22 = vshll.u32 %v438_v20, %v42_v11 }
  0x8d   :  { %v54_v25 = vshll.u32 %v439_v23, %v42_v11  ;;  %v57_v28 = vshll.u32 %v440_v26, %v42_v11  ;;  %vm60_vm1 = vcmp.lt.s32.totalorder %v41_v14, 1  ;;  %vm63_vm2 = vcmp.lt.s32.totalorder %v41_v14, 4 }
  0x8e   :  { %v46_v19 = vshrl.u32 %v437_v17, %v43_v13  ;;  %v49_v21 = vshrl.u32 %v438_v20, %v43_v13  ;;  %v52_v24 = vshrl.u32 %v439_v23, %v43_v13  ;;  %v55_v27 = vshrl.u32 %v440_v26, %v43_v13 }
  0x8f   :  { %v58_v30 = vshrl.u32 %v441_v29, %v43_v13  ;;  %v44_v40 = vshrl.u32 %v436_v15, %v43_v13  ;;  %vm62_vm3 = vcmp.lt.s32.totalorder %v41_v14, 3  ;;  %vm61_vm4 = vcmp.lt.s32.totalorder %v41_v14, 2 }
  0x90   :  { %v47_v32 = vor.u32 %v46_v19, %v45_v16  ;;  %v50_v33 = vor.u32 %v49_v21, %v48_v18  ;;  %v53_v34 = vor.u32 %v52_v24, %v51_v22  ;;  %v56_v35 = vor.u32 %v55_v27, %v54_v25 }
  0x91   :  { %v59_v36 = vor.u32 %v58_v30, %v57_v28  ;;  %v442_v24 = vmov 1966171168   ;;  %v240_v26 = vlaneseq }
  0x92   :  { %v65_v37 = vsel %vm63_vm2, %v53_v34, 2102212464  ;;  %v68_v38 = vsel %vm60_vm1, %v47_v32, %v50_v33  ;;  %v72_v39 = vsel %vm60_vm1, %v50_v33, %v53_v34  ;;  %v69_v41 = vsel %vm63_vm2, %v56_v35, 920167782 }
  0x93   :  { %v73_v42 = vsel %vm63_vm2, %v59_v36, 1326507024  ;;  %v70_v43 = vsel %vm62_vm3, %v53_v34, %v69_v41  ;;  %v64_v46 = vsel %vm60_vm1, %v44_v40, %v47_v32  ;;  %v66_v47 = vsel %vm62_vm3, %v50_v33, %v65_v37 }
  0x94   :  { %v74_v44 = vsel %vm62_vm3, %v56_v35, %v73_v42  ;;  %v71_v48 = vsel %vm61_vm4, %v68_v38, %v70_v43  ;;  %v67_v54 = vsel %vm61_vm4, %v64_v46, %v66_v47  ;;  %v238_v25 = vunpack.c.l.s4 %v442_v24 }
  0x95   :  { %v75_v49 = vsel %vm61_vm4, %v72_v39, %v74_v44  ;;  %v476_v52 = vmul.u32.u64.low %v76_v45, %v71_v48  ;;  %v477_v53 = vmul.u32.u64.high %v76_v45, %v71_v48, %v476_v52  ;;  %v83_v56 = vmul.u32 %v76_v45, %v67_v54 }
  0x96   :  { %v473_v50 = vmul.u32.u64.low %v76_v45, %v75_v49  ;;  %v474_v51 = vmul.u32.u64.high %v76_v45, %v75_v49, %v473_v50  ;;  %v239_v28 = vunpack.c.0.s8 %v238_v25  ;;  %v241_v29 = vshrl.u32 %v240_v26, 7 }
  0x97   :  { %v86_v55 = vadd.s32 1, %v477_v53 }
  0x98   :  { %vm85_vm5 = vc.u32 %v474_v51, %v476_v52  ;;  %v84_v5 = vadd.s32 %v476_v52, %v474_v51  ;;  %v242_v35 = vsub.s32 %v239_v28, %v241_v29 }
  0x99   :  { %v87_v57 = vsel %vm85_vm5, %v86_v55, %v477_v53 }
  0x9a   :  { %v88_v58 = vadd.s32 %v87_v57, %v83_v56 }
  0x9c   :  { %v89_v59 = vadd.s32 536870912, %v88_v58 }
  0x9e   :  { %v90_v60 = vshrl.u32 %v89_v59, 30 }
  0xa0   :  { %v91_v61 = vshll.u32 %v90_v60, 30  ;;  %v114_v19 = vsub.s32 4, %v90_v60 }
  0xa2   :  { %v92_v62 = vsub.s32 %v88_v58, %v91_v61  ;;  %v115_v22 = vsel %vm30_vm7, %v114_v19, %v90_v60 }
  0xa3   :  { %v117_v23 = vsel %vm29_vm8, 0, %v115_v22 }
  0xa4   :  { %v94_v63 = vsub.s32 0, %v92_v62  ;;  %v121_v27 = vadd.s32 3, %v117_v23  ;;  %v225_v31 = vand.u32 3, %v117_v23 }
  0xa6   :  { %v386_v0 = vmin.u32 %v94_v63, %v92_v62  ;;  %v122_v30 = vand.u32 3, %v121_v27  ;;  %vm230_vm10 = vcmp.eq.s32.totalorder %v225_v31, 2  ;;  %vm227_vm12 = vcmp.eq.s32.totalorder %v225_v31, 0 }
  0xa7   :  { %vm226_vm14 = vcmp.lt.s32.totalorder %v225_v31, 2 }
  0xa8   :  { %v96_v1 = vclz %v386_v0  ;;  %vm127_vm9 = vcmp.eq.s32.totalorder %v122_v30, 2  ;;  %vm124_vm11 = vcmp.eq.s32.totalorder %v122_v30, 0  ;;  %vm123_vm13 = vcmp.lt.s32.totalorder %v122_v30, 2 }
  0xaa   :  { %v387_v2 = vadd.s32 4294967294, %v96_v1 }
  0xac   :  { %vm388_vm6 = vcmp.lt.s32.totalorder %v387_v2, 0 }
  0xad   :  { %v99_v3 = vsel %vm388_vm6, 0, %v387_v2 }
  0xae   :  { %v100_v6 = vsub.s32 32, %v99_v3  ;;  %v104_v7 = vsub.s32 4294967266, %v99_v3  ;;  %v101_v8 = vshll.u32 %v92_v62, %v99_v3 }
  0xb0   :  { %v102_v10 = vshrl.u32 %v84_v5, %v100_v6  ;;  %v105_v11 = vadd.s32 127, %v104_v7 }
  0xb2   :  { %v103_v12 = vor.u32 %v102_v10, %v101_v8  ;;  %v106_v13 = vshll.u32 %v105_v11, 23 }
  0xb4   :  { %v107_v14 = vor.u32 4788187, %v106_v13  ;;  %v110_v16 = vcvt.s32.f32 %v103_v12 }
  0xb6   :  { %v108_v15 = vand.u32 2147483647, %v107_v14 }
  0xb8   :  { %v111_v17 = vmul.f32 %v110_v16, %v108_v15 }
  0xba   :  { %v112_v18 = vxor.u32 2147483648, %v111_v17 }
  0xbc   :  { %v113_v20 = vsel %vm30_vm7, %v112_v18, %v111_v17 }
  0xbd   :  { %v116_v21 = vsel %vm29_vm8, %v467_v4, %v113_v20 }
  0xbe   :  { %409 = vcosq.f32 %v116_v21 }
  0xbf   :  { %411 = vsinq.f32 %v116_v21 }
  0xcb   :  { %v410_v32 = vpop.eup %409 }
  0xcc   :  { %v412_v33 = vpop.eup %411  ;;  %v128_v34 = vxor.u32 2147483648, %v410_v32 }
  0xcd   :  { %v125_v9 = vxor.u32 2147483648, %v412_v33 }
  0xce   :  { %v129_v36 = vsel %vm127_vm9, %v128_v34, %v412_v33  ;;  %v232_v37 = vsel %vm230_vm10, %v128_v34, %v412_v33 }
  0xcf   :  { %v126_v38 = vsel %vm124_vm11, %v410_v32, %v125_v9  ;;  %v229_v39 = vsel %vm227_vm12, %v410_v32, %v125_v9 }
  0xd0   :  { %v130_v40 = vsel %vm123_vm13, %v126_v38, %v129_v36  ;;  %v233_v41 = vsel %vm226_vm14, %v229_v39, %v232_v37 }
  0xd1   :  { %v131_v42 = vsel %vm120_vm15, nan, %v130_v40  ;;  %v234_v43 = vsel %vm120_vm15, nan, %v233_v41 }
  0xd2   :  { %v236_v44 = vcombine.high %v131_v42, %v131_v42  ;;  %v243_v45 = vrot.slane %v131_v42, %v242_v35  ;;  %v303_v46 = vcombine.high %v234_v43, %v234_v43  ;;  %v310_v47 = vrot.slane %v234_v43, %v242_v35 }
  0xd4   :  { %v250_v48 = vrot.slane %v236_v44, %v242_v35  ;;  %v251_v49 = vcombine.high %v243_v45, %v243_v45  ;;  %v259_v50 = vrot.slane %v243_v45, %v242_v35  ;;  %v317_v51 = vrot.slane %v303_v46, %v242_v35 }
  0xd5   :  { %v318_v52 = vcombine.high %v310_v47, %v310_v47  ;;  %v326_v53 = vrot.slane %v310_v47, %v242_v35 }
  0xd6   :  { %v252_v54 = vcombine.high %v250_v48, %v250_v48  ;;  %v266_v55 = vrot.slane %v250_v48, %v242_v35  ;;  %v273_v56 = vrot.slane %v251_v49, %v242_v35  ;;  %v281_v57 = vcombine.high %v259_v50, %v259_v50  ;;  %294 = vst.msk [vmem:[#allocation2] sm:$0x1] %vm293_vm0, %v259_v50 }
  0xd7   :  { %v319_v4 = vcombine.high %v317_v51, %v317_v51  ;;  %v333_v58 = vrot.slane %v317_v51, %v242_v35  ;;  %v340_v59 = vrot.slane %v318_v52, %v242_v35  ;;  %v348_v60 = vcombine.high %v326_v53, %v326_v53  ;;  %360 = vst.msk [vmem:[#allocation2 + $0x1] sm:$0x1] %vm293_vm0, %v326_v53 }
  0xd8   :  { %v280_v61 = vrot.slane %v252_v54, %v242_v35  ;;  %v282_v62 = vcombine.high %v266_v55, %v266_v55  ;;  %v283_v63 = vcombine.high %v273_v56, %v273_v56  ;;  %295 = vst.msk [vmem:[#allocation2 + $0x2] sm:$0x1] %vm293_vm0, %v273_v56  ;;  %296 = vst.msk [vmem:[#allocation2 + $0x4] sm:$0x1] %vm293_vm0, %v281_v57 }
  0xd9   :  { %298 = vst.msk [vmem:[#allocation2 + $0x8] sm:$0x1] %vm293_vm0, %v266_v55  ;;  %v347_v0 = vrot.slane %v319_v4, %v242_v35  ;;  %v349_v1 = vcombine.high %v333_v58, %v333_v58  ;;  %v350_v2 = vcombine.high %v340_v59, %v340_v59  ;;  %361 = vst.msk [vmem:[#allocation2 + $0x3] sm:$0x1] %vm293_vm0, %v340_v59 }
  0xda   :  { %362 = vst.msk [vmem:[#allocation2 + $0x5] sm:$0x1] %vm293_vm0, %v348_v60  ;;  %364 = vst.msk [vmem:[#allocation2 + $0x9] sm:$0x1] %vm293_vm0, %v333_v58  ;;  %v284_v3 = vcombine.high %v280_v61, %v280_v61 }
  0xdb   :  { %297 = vst.msk [vmem:[#allocation2 + $0x6] sm:$0x1] %vm293_vm0, %v283_v63  ;;  %299 = vst.msk [vmem:[#allocation2 + $0xa] sm:$0x1] %vm293_vm0, %v280_v61  ;;  %v351_v5 = vcombine.high %v347_v0, %v347_v0 }
  0xdc   :  { %300 = vst.msk [vmem:[#allocation2 + $0xc] sm:$0x1] %vm293_vm0, %v282_v62  ;;  %363 = vst.msk [vmem:[#allocation2 + $0x7] sm:$0x1] %vm293_vm0, %v350_v2 }
  0xdd   :  { %365 = vst.msk [vmem:[#allocation2 + $0xb] sm:$0x1] %vm293_vm0, %v347_v0  ;;  %366 = vst.msk [vmem:[#allocation2 + $0xd] sm:$0x1] %vm293_vm0, %v349_v1 }
  0xde   :  { %301 = vst.msk [vmem:[#allocation2 + $0xe] sm:$0x1] %vm293_vm0, %v284_v3  ;;  %367 = vst.msk [vmem:[#allocation2 + $0xf] sm:$0x1] %vm293_vm0, %v351_v5 }
  0xdf   :  { %424 = shalt.err (!%p421_p4)
}
  0xe0   :  { %s444_s14 = smov 32   ;;  %s445_s15 = smov 2  }
  0xe1   :  { %379 = dma.vmem_to_hbm [thread:$0]  %s374_s1, 256, %s509_s2, [#allocation3], %s444_s14, %s444_s14, %s445_s15  }
  0xe2   :  { %433 = dma.done.wait [#allocation3], 256  }
  0xe3   :  { %434 = vsyncadd [#allocation3], 4294967040 }
  0xe4   :  { %383 = vsyncpa [#allocation3], 1 }

</bundles_post_ra>
